<compile_context>
chip_gen: v7x
topology: tpu7x:2x2x1
jax: 0.10.0
libtpu: 0.0.40
codegen_flags: <defaults>
</compile_context>

<pallas_src>
import functools

import jax
import jax.numpy as jnp
from jax.experimental import pallas as pl
from jax.experimental.pallas import tpu as pltpu


def _fused_pinn_kernel(xT_ref,            # VMEM: [d_in, TILE_N]
                       w1_ref, b1_ref,    # VMEM: [HFp, d_in], [HFp, 1]
                       w2_ref, b2_ref,    # VMEM: [HFp, HFp],  [HFp, 1]
                       w3_ref, b3_ref,    # VMEM: [d_out, HFp],[d_out, 1]
                       o_ref):            # VMEM: [d_out, TILE_N]
    x = xT_ref[...]
    # Load biases once per tile (broadcast along lanes on the VPU).
    b1 = b1_ref[...]
    b2 = b2_ref[...]
    b3 = b3_ref[...]

    h1 = jnp.tanh(
        jnp.dot(w1_ref[...], x, preferred_element_type=jnp.float32) + b1)
    h2 = jnp.tanh(
        jnp.dot(w2_ref[...], h1, preferred_element_type=jnp.float32) + b2)
    o_ref[...] = (
        jnp.dot(w3_ref[...], h2, preferred_element_type=jnp.float32) + b3)


def _pack_fused_params(params, epsilons, hf_pad):
    """Fuse per-network weights into one block-diagonal set (batch-last layout).

    Returns transposed (feature-major) weights:
      w1t: [hf_pad, d_in], b1: [hf_pad, 1]
      w2t: [hf_pad, hf_pad], b2: [hf_pad, 1]
      w3t: [d_out, hf_pad]  (epsilon folded in), b3: [d_out, 1]
    """
    num_nets, d_in, H = params["w1"].shape
    d_out = params["w3"].shape[-1]
    HF = num_nets * H
    assert hf_pad >= HF

    f32 = jnp.float32
    # Layer 1: rows are output features -> concat transposed blocks.
    w1t = jnp.concatenate(
        [params["w1"][i].astype(f32).T for i in range(num_nets)], axis=0)
    b1 = jnp.concatenate(
        [params["b1"][i].astype(f32).reshape(H, 1) for i in range(num_nets)],
        axis=0)
    # Layer 2: block-diagonal of transposed blocks.
    w2t = jnp.zeros((HF, HF), f32)
    for i in range(num_nets):
        w2t = w2t.at[i * H:(i + 1) * H, i * H:(i + 1) * H].set(
            params["w2"][i].astype(f32).T)
    b2 = jnp.concatenate(
        [params["b2"][i].astype(f32).reshape(H, 1) for i in range(num_nets)],
        axis=0)
    # Layer 3: fold epsilon and concatenate along the contraction axis.
    w3t = jnp.concatenate(
        [epsilons[i] * params["w3"][i].astype(f32).T for i in range(num_nets)],
        axis=1)                                            # [d_out, HF]
    b3 = sum(epsilons[i] * params["b3"][i].astype(f32).reshape(d_out, 1)
             for i in range(num_nets))                     # [d_out, 1]

    pad = hf_pad - HF
    w1t = jnp.pad(w1t, ((0, pad), (0, 0)))
    b1 = jnp.pad(b1, ((0, pad), (0, 0)))
    w2t = jnp.pad(w2t, ((0, pad), (0, pad)))
    b2 = jnp.pad(b2, ((0, pad), (0, 0)))
    w3t = jnp.pad(w3t, ((0, 0), (0, pad)))
    return w1t, b1, w2t, b2, w3t, b3


@functools.partial(jax.jit, static_argnames=("tile_n",))
def combined_pinn(x, params, epsilons, *, tile_n=512):
    """x: [N, d_in] f32. params: stacked per-net weights. epsilons: [num_nets]."""
    N, d_in = x.shape
    num_nets, _, H = params["w1"].shape
    d_out = params["w3"].shape[-1]

    # Fused hidden width, padded up to a lane-aligned multiple of 128.
    HF = num_nets * H
    hf_pad = max(128, ((HF + 127) // 128) * 128)

    w1t, b1, w2t, b2, w3t, b3 = _pack_fused_params(params, epsilons, hf_pad)

    # Batch-last layout; pad the batch axis to a multiple of the tile width.
    n_tiles = pl.cdiv(N, tile_n)
    n_pad = n_tiles * tile_n
    xT = jnp.pad(x.astype(jnp.float32).T, ((0, 0), (0, n_pad - N)))  # [d_in, n_pad]

    # Resident (full-array) blocks for the tiny fused weights; x/out tiled over N.
    resident = lambda shape: pl.BlockSpec(shape, lambda i: (0, 0))

    out_T = pl.pallas_call(
        _fused_pinn_kernel,
        out_shape=jax.ShapeDtypeStruct((d_out, n_pad), jnp.float32),
        grid=(n_tiles,),
        in_specs=[
            pl.BlockSpec((d_in, tile_n), lambda i: (0, i)),   # x tile
            resident((hf_pad, d_in)), resident((hf_pad, 1)),  # W1^T, b1
            resident((hf_pad, hf_pad)), resident((hf_pad, 1)),  # W2^T, b2
            resident((d_out, hf_pad)), resident((d_out, 1)),  # eps*W3^T, eps*b3
        ],
        out_specs=pl.BlockSpec((d_out, tile_n), lambda i: (0, i)),
        compiler_params=pltpu.CompilerParams(
            dimension_semantics=("parallel",)),
    )(xT, w1t, b1, w2t, b2, w3t, b3)

    return out_T[:, :N].T  # [N, d_out]


def reference_combined_pinn(x, params, epsilons):
    """Pure-JAX reference matching the PyTorch semantics."""
    u = 0.0
    for i in range(epsilons.shape[0]):
        h1 = jnp.tanh(x @ params["w1"][i] + params["b1"][i])
        h2 = jnp.tanh(h1 @ params["w2"][i] + params["b2"][i])
        y = h2 @ params["w3"][i] + params["b3"][i]
        u = u + epsilons[i] * y
    return u


if __name__ == "__main__":
    key = jax.random.PRNGKey(0)

    # PINN-like shapes: a batch of collocation points through 3 small MLPs.
    N, d_in, H, d_out = 1000, 2, 32, 1
    num_nets = 3

    keys = jax.random.split(key, 8)
    x = jax.random.normal(keys[0], (N, d_in), dtype=jnp.float32)

    params = {
        "w1": 0.5 * jax.random.normal(keys[1], (num_nets, d_in, H), jnp.float32),
        "b1": 0.1 * jax.random.normal(keys[2], (num_nets, 1, H), jnp.float32),
        "w2": 0.5 * jax.random.normal(keys[3], (num_nets, H, H), jnp.float32),
        "b2": 0.1 * jax.random.normal(keys[4], (num_nets, 1, H), jnp.float32),
        "w3": 0.5 * jax.random.normal(keys[5], (num_nets, H, d_out), jnp.float32),
        "b3": 0.1 * jax.random.normal(keys[6], (num_nets, 1, d_out), jnp.float32),
    }
    epsilons = jnp.array([1.0, 0.5, 0.25], dtype=jnp.float32)

    out = combined_pinn(x, params, epsilons, tile_n=512)
    out = jax.block_until_ready(out)

    ref = reference_combined_pinn(x, params, epsilons)
    assert out.shape == (N, d_out), out.shape
    assert jnp.allclose(out, ref, atol=1e-5, rtol=1e-5), (
        float(jnp.max(jnp.abs(out - ref))))

    print("KERNEL_OK")
</pallas_src>

<mosaic_0001>
module attributes {stable_mosaic.version = 11 : i64} {
  func.func @_fused_pinn_kernel(%arg0: i32, %arg1: memref<2x512xf32, #tpu.memory_space<vmem>>, %arg2: memref<128x2xf32, #tpu.memory_space<vmem>>, %arg3: memref<128x1xf32, #tpu.memory_space<vmem>>, %arg4: memref<128x128xf32, #tpu.memory_space<vmem>>, %arg5: memref<128x1xf32, #tpu.memory_space<vmem>>, %arg6: memref<1x128xf32, #tpu.memory_space<vmem>>, %arg7: memref<1x1xf32, #tpu.memory_space<vmem>>, %arg8: memref<1x512xf32, #tpu.memory_space<vmem>>) attributes {dimension_semantics = [#tpu.dimension_semantics<parallel>], iteration_bounds = array<i64: 2>, scalar_prefetch = 0 : i64, scratch_operands = 0 : i64, tpu.core_type = #tpu.core_type<tc>, window_params = [{transform_indices = @transform_0, window_bounds = array<i64: 2, 512>}, {pipeline_mode = #tpu.pipeline_mode<synchronous>, transform_indices = @transform_1, window_bounds = array<i64: 128, 2>}, {pipeline_mode = #tpu.pipeline_mode<synchronous>, transform_indices = @transform_2, window_bounds = array<i64: 128, 1>}, {pipeline_mode = #tpu.pipeline_mode<synchronous>, transform_indices = @transform_3, window_bounds = array<i64: 128, 128>}, {pipeline_mode = #tpu.pipeline_mode<synchronous>, transform_indices = @transform_4, window_bounds = array<i64: 128, 1>}, {pipeline_mode = #tpu.pipeline_mode<synchronous>, transform_indices = @transform_5, window_bounds = array<i64: 1, 128>}, {pipeline_mode = #tpu.pipeline_mode<synchronous>, transform_indices = @transform_6, window_bounds = array<i64: 1, 1>}, {transform_indices = @transform_7, window_bounds = array<i64: 1, 512>}]} {
    %c0 = arith.constant 0 : index
    %c0_0 = arith.constant 0 : index
    %0 = vector.load %arg1[%c0, %c0_0] : memref<2x512xf32, #tpu.memory_space<vmem>>, vector<2x512xf32>
    %c0_1 = arith.constant 0 : index
    %c0_2 = arith.constant 0 : index
    %1 = vector.load %arg3[%c0_1, %c0_2] : memref<128x1xf32, #tpu.memory_space<vmem>>, vector<128x1xf32>
    %c0_3 = arith.constant 0 : index
    %c0_4 = arith.constant 0 : index
    %2 = vector.load %arg5[%c0_3, %c0_4] : memref<128x1xf32, #tpu.memory_space<vmem>>, vector<128x1xf32>
    %c0_5 = arith.constant 0 : index
    %c0_6 = arith.constant 0 : index
    %3 = vector.load %arg7[%c0_5, %c0_6] : memref<1x1xf32, #tpu.memory_space<vmem>>, vector<1x1xf32>
    %c0_7 = arith.constant 0 : index
    %c0_8 = arith.constant 0 : index
    %4 = vector.load %arg2[%c0_7, %c0_8] : memref<128x2xf32, #tpu.memory_space<vmem>>, vector<128x2xf32>
    %cst = arith.constant dense<0.000000e+00> : vector<128x512xf32>
    %5 = tpu.matmul %4, %0, %cst {dimension_numbers = #tpu.dot_dimension_numbers<[1], [0], [0], [1], [0, 0, 1, 1], [], []>} : vector<128x2xf32>, vector<2x512xf32>, vector<128x512xf32> -> vector<128x512xf32>
    %6 = vector.broadcast %1 : vector<128x1xf32> to vector<128x512xf32>
    %7 = arith.addf %5, %6 : vector<128x512xf32>
    %8 = math.tanh %7 : vector<128x512xf32>
    %c0_9 = arith.constant 0 : index
    %c0_10 = arith.constant 0 : index
    %9 = vector.load %arg4[%c0_9, %c0_10] : memref<128x128xf32, #tpu.memory_space<vmem>>, vector<128x128xf32>
    %cst_11 = arith.constant dense<0.000000e+00> : vector<128x512xf32>
    %10 = tpu.matmul %9, %8, %cst_11 {dimension_numbers = #tpu.dot_dimension_numbers<[1], [0], [0], [1], [0, 0, 1, 1], [], []>} : vector<128x128xf32>, vector<128x512xf32>, vector<128x512xf32> -> vector<128x512xf32>
    %11 = vector.broadcast %2 : vector<128x1xf32> to vector<128x512xf32>
    %12 = arith.addf %10, %11 : vector<128x512xf32>
    %13 = math.tanh %12 : vector<128x512xf32>
    %c0_12 = arith.constant 0 : index
    %c0_13 = arith.constant 0 : index
    %14 = vector.load %arg6[%c0_12, %c0_13] : memref<1x128xf32, #tpu.memory_space<vmem>>, vector<1x128xf32>
    %cst_14 = arith.constant dense<0.000000e+00> : vector<1x512xf32>
    %15 = tpu.matmul %14, %13, %cst_14 {dimension_numbers = #tpu.dot_dimension_numbers<[1], [0], [0], [1], [0, 0, 1, 1], [], []>} : vector<1x128xf32>, vector<128x512xf32>, vector<1x512xf32> -> vector<1x512xf32>
    %16 = vector.broadcast %3 : vector<1x1xf32> to vector<1x512xf32>
    %17 = arith.addf %15, %16 : vector<1x512xf32>
    %c0_15 = arith.constant 0 : index
    %c0_16 = arith.constant 0 : index
    %18 = vector.load %arg8[%c0_15, %c0_16] : memref<1x512xf32, #tpu.memory_space<vmem>>, vector<1x512xf32>
    tpu.vector_store %arg8[%c0_15, %c0_16], %17 {strides = array<i32>} : memref<1x512xf32, #tpu.memory_space<vmem>>, vector<1x512xf32>,
    return
  }
  func.func @transform_0(%arg0: i32) -> (i32, i32) {
    %c0_i32 = arith.constant 0 : i32
    %c0_i32_0 = arith.constant 0 : i32
    return %c0_i32, %arg0 : i32, i32
  }
  func.func @transform_1(%arg0: i32) -> (i32, i32) {
    %c0_i32 = arith.constant 0 : i32
    %c0_i32_0 = arith.constant 0 : i32
    %c0_i32_1 = arith.constant 0 : i32
    return %c0_i32, %c0_i32_0 : i32, i32
  }
  func.func @transform_2(%arg0: i32) -> (i32, i32) {
    %c0_i32 = arith.constant 0 : i32
    %c0_i32_0 = arith.constant 0 : i32
    %c0_i32_1 = arith.constant 0 : i32
    return %c0_i32, %c0_i32_0 : i32, i32
  }
  func.func @transform_3(%arg0: i32) -> (i32, i32) {
    %c0_i32 = arith.constant 0 : i32
    %c0_i32_0 = arith.constant 0 : i32
    %c0_i32_1 = arith.constant 0 : i32
    return %c0_i32, %c0_i32_0 : i32, i32
  }
  func.func @transform_4(%arg0: i32) -> (i32, i32) {
    %c0_i32 = arith.constant 0 : i32
    %c0_i32_0 = arith.constant 0 : i32
    %c0_i32_1 = arith.constant 0 : i32
    return %c0_i32, %c0_i32_0 : i32, i32
  }
  func.func @transform_5(%arg0: i32) -> (i32, i32) {
    %c0_i32 = arith.constant 0 : i32
    %c0_i32_0 = arith.constant 0 : i32
    %c0_i32_1 = arith.constant 0 : i32
    return %c0_i32, %c0_i32_0 : i32, i32
  }
  func.func @transform_6(%arg0: i32) -> (i32, i32) {
    %c0_i32 = arith.constant 0 : i32
    %c0_i32_0 = arith.constant 0 : i32
    %c0_i32_1 = arith.constant 0 : i32
    return %c0_i32, %c0_i32_0 : i32, i32
  }
  func.func @transform_7(%arg0: i32) -> (i32, i32) {
    %c0_i32 = arith.constant 0 : i32
    %c0_i32_0 = arith.constant 0 : i32
    return %c0_i32, %arg0 : i32, i32
  }
}

</mosaic_0001>

<bundles_post_ra>
// kernel: combined_pinn.1
= control target key start
LH: loop header
LB: loop body
LE: loop exit
PB: predicated region body
PF: predicated region fallthrough
CT: control target
= control target key end

     0   :  { %s2092_s26 = smov 0   ;;  %s2417_s0 = inlined_call_operand.vmem [shape: f32[2,1024], index: 0, kind: input, shape index: {}]   ;;  %s2418_s1 = inlined_call_operand.vmem [shape: f32[128,2], index: 1, kind: input, shape index: {}]   ;;  %s2419_s2 = inlined_call_operand.vmem [shape: f32[128,1], index: 2, kind: input, shape index: {}]   ;;  %s2420_s3 = inlined_call_operand.vmem [shape: f32[128,128], index: 3, kind: input, shape index: {}]   ;;  %s2421_s4 = inlined_call_operand.vmem [shape: f32[128,1], index: 4, kind: input, shape index: {}]   ;;  %s2422_s5 = inlined_call_operand.vmem [shape: f32[1,128], index: 5, kind: input, shape index: {}]   ;;  %s2423_s6 = inlined_call_operand.<no memory space> [shape: f32[1,1], index: 6, kind: input, shape index: {}]   ;;  %s2424_s7 = inlined_call_operand.vmem [shape: f32[1,1024], index: 7, kind: output, shape index: {}]  }
   0x1   :  { %v12_v0 = vstv %s2423_s6 }
   0x2   :  { %13 = vst [vmem:[#allocation2] sm:$0x1] %v12_v0 }
   0x3 LB: > { %s1592_s27 = sadd.s32 4294967295, %s2043_s26   ;;  %p1596_p0 = scmp.ge.s32.totalorder %s2043_s26, 1  ;;  %s2043_s26 = sphi %s2092_s26, %s19_s26  }
   0x4   : > { %p240_p1 = scmp.lt.s32.totalorder %s2043_s26, 3 }
   0x6   : > { %p241_p2 = pnand %p1596_p0, %p240_p1 }
   0x7   : > { %s1597_s28 = sshll.u32 (!%p241_p2), %s1592_s27, 2  ;;  %v417_v1 = vlaneseq (!%p241_p2)  ;;  %v2045_v2 = vmov (!%p241_p2), 1983009808   ;;  %v2046_v4 = vmov (!%p241_p2), 0.0   ;;  %v2047_v6 = vmov (!%p241_p2), 0   ;;  %v283_v7 = vld [vmem:[%s2419_s2] sm:$0xff] (!%p241_p2) }
   0x8   : > { %244 = sbr.rel (%p241_p2) target bundleno = 843 (0x34b), region = 48  ;;  %p272_p3 = scmp.lt.s32.totalorder (!%p241_p2), %s1597_s28, 7  ;;  %v415_v3 = vunpack.c.l.s4 (!%p241_p2), %v2045_v2  ;;  %552 = vmatprep.mubr.f32.mxu0 (!%p241_p2), %v2046_v4  ;;  %713 = vmatprep.mubr.f32.mxu1 (!%p241_p2), %v2046_v4  ;;  %v284_v9 = vld [vmem:[%s2419_s2 + $0x8] sm:$0xff] (!%p241_p2)  ;;  %v285_v10 = vld [vmem:[%s2419_s2 + $0x10] sm:$0xff] (!%p241_p2)  ;;  %v286_v12 = vld [vmem:[%s2419_s2 + $0x18] sm:$0xff] (!%p241_p2)  ;;  %vm479_vm0 = vcmask (!%p241_p2), 1041408  }
   0x9   : > { %v2103_v5 = vshrl.u32 (!%p241_p2), %v417_v1, 7  ;;  %1778 = vset.pattern.permute.xlu0 (!%p241_p2), %v2047_v6  ;;  %1779 = vset.pattern.permute.xlu1 (!%p241_p2), %v2047_v6  ;;  %v287_v16 = vld [vmem:[%s2419_s2 + $0x20] sm:$0xff] (!%p241_p2)  ;;  %v288_v19 = vld [vmem:[%s2419_s2 + $0x28] sm:$0xff] (!%p241_p2)  ;;  %vm430_vm1 = vcmask (!%p241_p2), 15360   ;;  %v289_v22 = vld [vmem:[%s2419_s2 + $0x30] sm:$0xff] (!%p241_p2)  ;;  %vm1539_vm2 = vcmp.lt.s32.totalorder (!%p241_p2), %v417_v1, 512 }
   0xa   : > { %v416_v8 = vunpack.c.0.s8 (!%p241_p2), %v415_v3  ;;  %334 = vperm.xlu0 (!%p241_p2), %1778, %v283_v7   ;;  %344 = vperm.xlu1 (!%p241_p2), %1779, %v285_v10   ;;  %v316_v20 = vld [vmem:[%s2418_s1] sm:$0xff] (!%p241_p2)  ;;  %v290_v23 = vld [vmem:[%s2419_s2 + $0x38] sm:$0xff] (!%p241_p2)  ;;  %v317_v24 = vld [vmem:[%s2418_s1 + $0x8] sm:$0xff] (!%p241_p2) }
   0xb   : > { %v291_v25 = vld [vmem:[%s2419_s2 + $0x40] sm:$0xff] (!%p241_p2)  ;;  %v292_v26 = vld [vmem:[%s2419_s2 + $0x48] sm:$0xff] (!%p241_p2)  ;;  %v318_v27 = vld [vmem:[%s2418_s1 + $0x10] sm:$0xff] (!%p241_p2) }
   0xc   : > { %v419_v11 = vsub.s32 (!%p241_p2), %v416_v8, %v2103_v5  ;;  %v293_v28 = vld [vmem:[%s2419_s2 + $0x50] sm:$0xff] (!%p241_p2)  ;;  %v294_v29 = vld [vmem:[%s2419_s2 + $0x58] sm:$0xff] (!%p241_p2)  ;;  %v295_v31 = vld [vmem:[%s2419_s2 + $0x60] sm:$0xff] (!%p241_p2) }
   0xd   : > { %v319_v30 = vld [vmem:[%s2418_s1 + $0x18] sm:$0xff] (!%p241_p2)  ;;  %v296_v32 = vld [vmem:[%s2419_s2 + $0x68] sm:$0xff] (!%p241_p2)  ;;  %v320_v33 = vld [vmem:[%s2418_s1 + $0x20] sm:$0xff] (!%p241_p2) }
   0xe   : > { %339 = vperm.xlu0 (!%p241_p2), %1778, %v284_v9   ;;  %349 = vperm.xlu1 (!%p241_p2), %1779, %v286_v12   ;;  %v297_v34 = vld [vmem:[%s2419_s2 + $0x70] sm:$0xff] (!%p241_p2)  ;;  %v298_v35 = vld [vmem:[%s2419_s2 + $0x78] sm:$0xff] (!%p241_p2)  ;;  %v321_v36 = vld [vmem:[%s2418_s1 + $0x28] sm:$0xff] (!%p241_p2) }
   0xf   : > { %s2426_s28 = smov (!%p272_p3, %s1597_s28), 7  ;;  %v299_v37 = vld [vmem:[%s2421_s4] sm:$0xff]  ;;  %v300_v38 = vld [vmem:[%s2421_s4 + $0x8] sm:$0xff]  ;;  %v322_v39 = vld [vmem:[%s2418_s1 + $0x30] sm:$0xff] }
  0x10   : > { %s1598_s11 = sshll.u32 %s2426_s28, 1  ;;  %v301_v40 = vld [vmem:[%s2421_s4 + $0x10] sm:$0xff]  ;;  %v302_v41 = vld [vmem:[%s2421_s4 + $0x18] sm:$0xff]  ;;  %v303_v43 = vld [vmem:[%s2421_s4 + $0x20] sm:$0xff]  ;;  %s280_s9 = scalar_lea.vmem %s2424_s7, %s2426_s28 }
  0x11   : > { %s275_s14 = scalar_lea.vmem %s2417_s0, %s1598_s11  ;;  %v323_v42 = vld [vmem:[%s2418_s1 + $0x38] sm:$0xff]  ;;  %v304_v44 = vld [vmem:[%s2421_s4 + $0x28] sm:$0xff]  ;;  %v324_v45 = vld [vmem:[%s2418_s1 + $0x40] sm:$0xff] }
  0x12   : > { %v282_v13 = vld [vmem:[%s275_s14] sm:$0xff]  ;;  %354 = vperm.xlu0 %1778, %v287_v16   ;;  %359 = vperm.xlu1 %1779, %v288_v19   ;;  %v305_v46 = vld [vmem:[%s2421_s4 + $0x30] sm:$0xff]  ;;  %v306_v47 = vld [vmem:[%s2421_s4 + $0x38] sm:$0xff] }
  0x13   : > { %v420_v14 = vrot.slane %v282_v13, %v419_v11  ;;  %v413_v15 = vcombine.high %v282_v13, %v282_v13  ;;  %v325_v48 = vld [vmem:[%s2418_s1 + $0x48] sm:$0xff]  ;;  %v307_v49 = vld [vmem:[%s2421_s4 + $0x40] sm:$0xff]  ;;  %v326_v51 = vld [vmem:[%s2418_s1 + $0x50] sm:$0xff] }
  0x14   : > { %v308_v50 = vld [vmem:[%s2421_s4 + $0x48] sm:$0xff]  ;;  %v309_v52 = vld [vmem:[%s2421_s4 + $0x50] sm:$0xff]  ;;  %v310_v53 = vld [vmem:[%s2421_s4 + $0x58] sm:$0xff] }
  0x15   : > { %v428_v17 = vcombine.high %v420_v14, %v420_v14  ;;  %v427_v18 = vrot.slane %v413_v15, %v419_v11  ;;  %v327_v54 = vld [vmem:[%s2418_s1 + $0x58] sm:$0xff]  ;;  %v311_v55 = vld [vmem:[%s2421_s4 + $0x60] sm:$0xff]  ;;  %v312_v56 = vld [vmem:[%s2421_s4 + $0x68] sm:$0xff] }
  0x16   : > { %364 = vperm.xlu0 %1778, %v289_v22   ;;  %369 = vperm.xlu1 %1779, %v290_v23   ;;  %v328_v57 = vld [vmem:[%s2418_s1 + $0x60] sm:$0xff]  ;;  %v313_v58 = vld [vmem:[%s2421_s4 + $0x70] sm:$0xff]  ;;  %v314_v59 = vld [vmem:[%s2421_s4 + $0x78] sm:$0xff] }
  0x17   : > { %1600 = vmatprep.subr.msk.mxu0 %vm479_vm0, %v428_v17  ;;  %v429_v21 = vcombine.high %v427_v18, %v427_v18  ;;  %v329_v60 = vld [vmem:[%s2418_s1 + $0x68] sm:$0xff]  ;;  %v315_v61 = vld [vmem:[#allocation2] sm:$0x1]  ;;  %v330_v62 = vld [vmem:[%s2418_s1 + $0x70] sm:$0xff] }
  0x18   : > { %1601 = vmatpush1.msk.msra.mxu0 %vm479_vm0, %v420_v14  ;;  %v331_v63 = vld [vmem:[%s2418_s1 + $0x78] sm:$0xff] }
  0x19   : > { %1602 = vmatmul.mubr.msk.f32.vlgmr.msra.gmra.mrb[0].mxu0 %vm430_vm1, %v316_v20  ;;  %1618 = vmatprep.subr.msk.mxu1 %vm479_vm0, %v429_v21 }
  0x1a   : > { %1619 = vmatpush1.msk.msra.mxu1 %vm479_vm0, %v427_v18  ;;  %558 = vmatprep.mubr.f32.mxu0 %v2046_v4 }
  0x1b   : > { %1620 = vmatmul.mubr.msk.f32.vlgmr.msra.gmra.mrb[0].mxu1 %vm430_vm1, %v316_v20  ;;  %374 = vperm.xlu0 %1778, %v291_v25  }
  0x1c   : > { %719 = vmatprep.mubr.f32.mxu1 %v2046_v4  ;;  %379 = vperm.xlu1 %1779, %v292_v26  }
  0x1d   : > { %1603 = vmatmul.mubr.msk.f32.gmra.mrb[2].mxu0 %vm430_vm1, %v317_v24 }
  0x1e   : > { %564 = vmatprep.mubr.f32.mxu0 %v2046_v4 }
  0x1f   : > { %1621 = vmatmul.mubr.msk.f32.gmra.mrb[2].mxu1 %vm430_vm1, %v317_v24  ;;  %384 = vperm.xlu0 %1778, %v293_v28  }
  0x20   : > { %725 = vmatprep.mubr.f32.mxu1 %v2046_v4  ;;  %389 = vperm.xlu1 %1779, %v294_v29  }
  0x21   : > { %1604 = vmatmul.mubr.msk.f32.gmra.mrb[4].mxu0 %vm430_vm1, %v318_v27 }
  0x22   : > { %570 = vmatprep.mubr.f32.mxu0 %v2046_v4 }
  0x23   : > { %1622 = vmatmul.mubr.msk.f32.gmra.mrb[4].mxu1 %vm430_vm1, %v318_v27  ;;  %394 = vperm.xlu0 %1778, %v295_v31  }
  0x24   : > { %731 = vmatprep.mubr.f32.mxu1 %v2046_v4  ;;  %399 = vperm.xlu1 %1779, %v296_v32  }
  0x25   : > { %1605 = vmatmul.mubr.msk.f32.gmra.mrb[6].mxu0 %vm430_vm1, %v319_v30 }
  0x26   : > { %576 = vmatprep.mubr.f32.mxu0 %v2046_v4 }
  0x27   : > { %1623 = vmatmul.mubr.msk.f32.gmra.mrb[6].mxu1 %vm430_vm1, %v319_v30  ;;  %404 = vperm.xlu0 %1778, %v297_v34  }
  0x28   : > { %737 = vmatprep.mubr.f32.mxu1 %v2046_v4  ;;  %409 = vperm.xlu1 %1779, %v298_v35  }
  0x29   : > { %1606 = vmatmul.mubr.msk.f32.gmra.mrb[8].mxu0 %vm430_vm1, %v320_v33 }
  0x2a   : > { %582 = vmatprep.mubr.f32.mxu0 %v2046_v4 }
  0x2b   : > { %1624 = vmatmul.mubr.msk.f32.gmra.mrb[8].mxu1 %vm430_vm1, %v320_v33  ;;  %892 = vperm.xlu0 %1778, %v299_v37  }
  0x2c   : > { %743 = vmatprep.mubr.f32.mxu1 %v2046_v4  ;;  %897 = vperm.xlu1 %1779, %v300_v38  }
  0x2d   : > { %1607 = vmatmul.mubr.msk.f32.gmra.mrb[10].mxu0 %vm430_vm1, %v321_v36 }
  0x2e   : > { %588 = vmatprep.mubr.f32.mxu0 %v2046_v4 }
  0x2f   : > { %1625 = vmatmul.mubr.msk.f32.gmra.mrb[10].mxu1 %vm430_vm1, %v321_v36  ;;  %902 = vperm.xlu0 %1778, %v301_v40  }
  0x30   : > { %749 = vmatprep.mubr.f32.mxu1 %v2046_v4  ;;  %907 = vperm.xlu1 %1779, %v302_v41  }
  0x31   : > { %1608 = vmatmul.mubr.msk.f32.gmra.mrb[12].mxu0 %vm430_vm1, %v322_v39 }
  0x32   : > { %594 = vmatprep.mubr.f32.mxu0 %v2046_v4 }
  0x33   : > { %1626 = vmatmul.mubr.msk.f32.gmra.mrb[12].mxu1 %vm430_vm1, %v322_v39  ;;  %912 = vperm.xlu0 %1778, %v303_v43  }
  0x34   : > { %755 = vmatprep.mubr.f32.mxu1 %v2046_v4  ;;  %917 = vperm.xlu1 %1779, %v304_v44  }
  0x35   : > { %1609 = vmatmul.mubr.msk.f32.gmra.mrb[14].mxu0 %vm430_vm1, %v323_v42 }
  0x36   : > { %600 = vmatprep.mubr.f32.mxu0 %v2046_v4 }
  0x37   : > { %1627 = vmatmul.mubr.msk.f32.gmra.mrb[14].mxu1 %vm430_vm1, %v323_v42  ;;  %922 = vperm.xlu0 %1778, %v305_v46  }
  0x38   : > { %761 = vmatprep.mubr.f32.mxu1 %v2046_v4  ;;  %927 = vperm.xlu1 %1779, %v306_v47  }
  0x39   : > { %1610 = vmatmul.mubr.msk.f32.gmra.mrb[16].mxu0 %vm430_vm1, %v324_v45 }
  0x3a   : > { %606 = vmatprep.mubr.f32.mxu0 %v2046_v4 }
  0x3b   : > { %1628 = vmatmul.mubr.msk.f32.gmra.mrb[16].mxu1 %vm430_vm1, %v324_v45  ;;  %932 = vperm.xlu0 %1778, %v307_v49  }
  0x3c   : > { %767 = vmatprep.mubr.f32.mxu1 %v2046_v4  ;;  %937 = vperm.xlu1 %1779, %v308_v50  }
  0x3d   : > { %1611 = vmatmul.mubr.msk.f32.gmra.mrb[18].mxu0 %vm430_vm1, %v325_v48 }
  0x3e   : > { %612 = vmatprep.mubr.f32.mxu0 %v2046_v4 }
  0x3f   : > { %1629 = vmatmul.mubr.msk.f32.gmra.mrb[18].mxu1 %vm430_vm1, %v325_v48  ;;  %942 = vperm.xlu0 %1778, %v309_v52  }
  0x40   : > { %773 = vmatprep.mubr.f32.mxu1 %v2046_v4  ;;  %947 = vperm.xlu1 %1779, %v310_v53  }
  0x41   : > { %1612 = vmatmul.mubr.msk.f32.gmra.mrb[20].mxu0 %vm430_vm1, %v326_v51 }
  0x42   : > { %618 = vmatprep.mubr.f32.mxu0 %v2046_v4 }
  0x43   : > { %1630 = vmatmul.mubr.msk.f32.gmra.mrb[20].mxu1 %vm430_vm1, %v326_v51  ;;  %952 = vperm.xlu0 %1778, %v311_v55  }
  0x44   : > { %779 = vmatprep.mubr.f32.mxu1 %v2046_v4  ;;  %957 = vperm.xlu1 %1779, %v312_v56  }
  0x45   : > { %1613 = vmatmul.mubr.msk.f32.gmra.mrb[22].mxu0 %vm430_vm1, %v327_v54 }
  0x46   : > { %624 = vmatprep.mubr.f32.mxu0 %v2046_v4 }
  0x47   : > { %1631 = vmatmul.mubr.msk.f32.gmra.mrb[22].mxu1 %vm430_vm1, %v327_v54  ;;  %962 = vperm.xlu0 %1778, %v313_v58  }
  0x48   : > { %785 = vmatprep.mubr.f32.mxu1 %v2046_v4  ;;  %967 = vperm.xlu1 %1779, %v314_v59  }
  0x49   : > { %1614 = vmatmul.mubr.msk.f32.gmra.mrb[24].mxu0 %vm430_vm1, %v328_v57 }
  0x4a   : > { %630 = vmatprep.mubr.f32.mxu0 %v2046_v4 }
  0x4b   : > { %1632 = vmatmul.mubr.msk.f32.gmra.mrb[24].mxu1 %vm430_vm1, %v328_v57  ;;  %1359 = vperm.xlu0 %1778, %v315_v61  }
  0x4c   : > { %791 = vmatprep.mubr.f32.mxu1 %v2046_v4 }
  0x4d   : > { %1615 = vmatmul.mubr.msk.f32.gmra.mrb[26].mxu0 %vm430_vm1, %v329_v60 }
  0x4e   : > { %636 = vmatprep.mubr.f32.mxu0 %v2046_v4 }
  0x4f   : > { %1633 = vmatmul.mubr.msk.f32.gmra.mrb[26].mxu1 %vm430_vm1, %v329_v60 }
  0x50   : > { %797 = vmatprep.mubr.f32.mxu1 %v2046_v4 }
  0x51   : > { %1616 = vmatmul.mubr.msk.f32.gmra.mrb[28].mxu0 %vm430_vm1, %v330_v62 }
  0x52   : > { %642 = vmatprep.mubr.f32.mxu0 %v2046_v4 }
  0x53   : > { %1634 = vmatmul.mubr.msk.f32.gmra.mrb[28].mxu1 %vm430_vm1, %v330_v62 }
  0x54   : > { %803 = vmatprep.mubr.f32.mxu1 %v2046_v4 }
  0x55   : > { %1617 = vmatmul.mubr.msk.f32.gmra.mrb[30].mxu0 %vm430_vm1, %v331_v63 }
  0x56   : > { %1034 = vmatprep.mubr.f32.mxu0 %v2046_v4 }
  0x57   : > { %1635 = vmatmul.mubr.msk.f32.gmra.mrb[30].mxu1 %vm430_vm1, %v331_v63 }
  0x58   : > { %1195 = vmatprep.mubr.f32.mxu1 %v2046_v4 }
  0x89   : > { %v335_v0 = vpop.permute.xlu0 %334  ;;  %v345_v16 = vpop.permute.xlu1 %344 }
  0x8d   : > { %v340_v11 = vpop.permute.xlu0 %339  ;;  %v350_v29 = vpop.permute.xlu1 %349 }
  0x91   : > { %v355_v42 = vpop.permute.xlu0 %354  ;;  %v360_v57 = vpop.permute.xlu1 %359 }
  0xec   : > { %v554_v2 = vpop.f32.mrb[0].mxu0 }
  0xed   : > { %v555_v3 = vadd.f32 %v554_v2, %v335_v0  ;;  %v556_v6 = vpop.f32.mrb[1].mxu0 }
  0xee   : > { %v557_v7 = vadd.f32 %v556_v6, %v335_v0  ;;  %v715_v8 = vpop.f32.mrb[0].mxu1 }
  0xef   : > { %1781 = vtanh.f32 %v555_v3  ;;  %v716_v9 = vadd.f32 %v715_v8, %v335_v0  ;;  %v717_v10 = vpop.f32.mrb[1].mxu1 }
  0xf0   : > { %1783 = vtanh.f32 %v557_v7  ;;  %v718_v12 = vadd.f32 %v717_v10, %v335_v0  ;;  %v560_v13 = vpop.f32.mrb[2].mxu0 }
  0xf1   : > { %1785 = vtanh.f32 %v716_v9  ;;  %v561_v14 = vadd.f32 %v560_v13, %v340_v11  ;;  %v562_v15 = vpop.f32.mrb[3].mxu0 }
  0xf2   : > { %1787 = vtanh.f32 %v718_v12  ;;  %v563_v17 = vadd.f32 %v562_v15, %v340_v11  ;;  %v721_v18 = vpop.f32.mrb[2].mxu1 }
  0xf3   : > { %1789 = vtanh.f32 %v561_v14  ;;  %v722_v19 = vadd.f32 %v721_v18, %v340_v11  ;;  %v723_v20 = vpop.f32.mrb[3].mxu1 }
  0xf4   : > { %1791 = vtanh.f32 %v563_v17  ;;  %v724_v21 = vadd.f32 %v723_v20, %v340_v11  ;;  %v566_v22 = vpop.f32.mrb[4].mxu0  ;;  %v365_v11 = vpop.permute.xlu0 %364 }
  0xf5   : > { %1793 = vtanh.f32 %v722_v19  ;;  %v567_v23 = vadd.f32 %v566_v22, %v345_v16  ;;  %v568_v24 = vpop.f32.mrb[5].mxu0 }
  0xf6   : > { %1795 = vtanh.f32 %v724_v21  ;;  %v569_v25 = vadd.f32 %v568_v24, %v345_v16  ;;  %v727_v26 = vpop.f32.mrb[4].mxu1 }
  0xf7   : > { %1797 = vtanh.f32 %v567_v23  ;;  %v728_v27 = vadd.f32 %v727_v26, %v345_v16  ;;  %v729_v28 = vpop.f32.mrb[5].mxu1  ;;  %v370_v26 = vpop.permute.xlu1 %369 }
  0xf8   : > { %1799 = vtanh.f32 %v569_v25  ;;  %v730_v30 = vadd.f32 %v729_v28, %v345_v16  ;;  %v572_v31 = vpop.f32.mrb[6].mxu0 }
  0xf9   : > { %v1782_v32 = vpop.eup %1781  ;;  %1801 = vtanh.f32 %v728_v27  ;;  %v573_v33 = vadd.f32 %v572_v31, %v350_v29  ;;  %v574_v34 = vpop.f32.mrb[7].mxu0 }
  0xfa   : > { %v1784_v35 = vpop.eup %1783  ;;  %1803 = vtanh.f32 %v730_v30  ;;  %v575_v36 = vadd.f32 %v574_v34, %v350_v29  ;;  %v733_v37 = vpop.f32.mrb[6].mxu1 }
  0xfb   : > { %v1786_v38 = vpop.eup %1785  ;;  %1805 = vtanh.f32 %v573_v33  ;;  %v734_v39 = vadd.f32 %v733_v37, %v350_v29  ;;  %v735_v40 = vpop.f32.mrb[7].mxu1 }
  0xfc   : > { %v1788_v41 = vpop.eup %1787  ;;  %1807 = vtanh.f32 %v575_v36  ;;  %v736_v43 = vadd.f32 %v735_v40, %v350_v29  ;;  %v578_v44 = vpop.f32.mrb[8].mxu0 }
  0xfd   : > { %v1790_v45 = vpop.eup %1789  ;;  %1809 = vtanh.f32 %v734_v39  ;;  %v579_v46 = vadd.f32 %v578_v44, %v355_v42  ;;  %v580_v47 = vpop.f32.mrb[9].mxu0 }
  0xfe   : > { %v1792_v48 = vpop.eup %1791  ;;  %1811 = vtanh.f32 %v736_v43  ;;  %v581_v49 = vadd.f32 %v580_v47, %v355_v42  ;;  %v739_v50 = vpop.f32.mrb[8].mxu1  ;;  %v1640_v51 = vpack.c.bf16 %v1790_v45, %v1782_v32 }
  0xff   : > { %v1794_v52 = vpop.eup %1793  ;;  %1813 = vtanh.f32 %v579_v46  ;;  %v740_v53 = vadd.f32 %v739_v50, %v355_v42  ;;  %v741_v54 = vpop.f32.mrb[9].mxu1  ;;  %v1638_v55 = vpack.c.bf16 %v1792_v48, %v1784_v35 }
 0x100   : > { %v1796_v56 = vpop.eup %1795  ;;  %1815 = vtanh.f32 %v581_v49  ;;  %v742_v58 = vadd.f32 %v741_v54, %v355_v42  ;;  %v584_v59 = vpop.f32.mrb[10].mxu0  ;;  %v1672_v60 = vpack.c.bf16 %v1794_v52, %v1786_v38 }
 0x101   : > { %v1798_v61 = vpop.eup %1797  ;;  %1817 = vtanh.f32 %v740_v53  ;;  %v585_v62 = vadd.f32 %v584_v59, %v360_v57  ;;  %v586_v63 = vpop.f32.mrb[11].mxu0  ;;  %1639 = vmatprep.subr.bf16.mxu0 %v1638_v55  ;;  %v1670_v0 = vpack.c.bf16 %v1796_v56, %v1788_v41 }
 0x102   : > { %v1800_v2 = vpop.eup %1799  ;;  %1819 = vtanh.f32 %v742_v58  ;;  %v587_v3 = vadd.f32 %v586_v63, %v360_v57  ;;  %v745_v6 = vpop.f32.mrb[10].mxu1  ;;  %1641 = vmatpush1.bf16.msra.mxu0 %v1640_v51 }
 0x103   : > { %v1802_v7 = vpop.eup %1801  ;;  %1821 = vtanh.f32 %v585_v62  ;;  %v746_v8 = vadd.f32 %v745_v6, %v360_v57  ;;  %v747_v9 = vpop.f32.mrb[11].mxu1  ;;  %1671 = vmatprep.subr.bf16.mxu1 %v1670_v0 }
 0x104   : > { %v1804_v10 = vpop.eup %1803  ;;  %1823 = vtanh.f32 %v587_v3  ;;  %v748_v12 = vadd.f32 %v747_v9, %v360_v57  ;;  %v590_v13 = vpop.f32.mrb[12].mxu0  ;;  %1673 = vmatpush1.bf16.msra.mxu1 %v1672_v60 }
 0x105   : > { %v1806_v14 = vpop.eup %1805  ;;  %1825 = vtanh.f32 %v746_v8  ;;  %v591_v15 = vadd.f32 %v590_v13, %v365_v11  ;;  %v592_v16 = vpop.f32.mrb[13].mxu0 }
 0x106   : > { %v1808_v17 = vpop.eup %1807  ;;  %1827 = vtanh.f32 %v748_v12  ;;  %v593_v18 = vadd.f32 %v592_v16, %v365_v11  ;;  %v751_v19 = vpop.f32.mrb[12].mxu1  ;;  %v1644_v20 = vpack.c.bf16 %v1806_v14, %v1798_v61 }
 0x107   : > { %v1810_v21 = vpop.eup %1809  ;;  %1829 = vtanh.f32 %v591_v15  ;;  %v752_v22 = vadd.f32 %v751_v19, %v365_v11  ;;  %v753_v23 = vpop.f32.mrb[13].mxu1  ;;  %v1642_v24 = vpack.c.bf16 %v1808_v17, %v1800_v2 }
 0x108   : > { %v1812_v25 = vpop.eup %1811  ;;  %1831 = vtanh.f32 %v593_v18  ;;  %v754_v27 = vadd.f32 %v753_v23, %v365_v11  ;;  %v596_v28 = vpop.f32.mrb[14].mxu0  ;;  %v1676_v29 = vpack.c.bf16 %v1810_v21, %v1802_v7 }
 0x109   : > { %v1814_v30 = vpop.eup %1813  ;;  %1833 = vtanh.f32 %v752_v22  ;;  %v597_v31 = vadd.f32 %v596_v28, %v370_v26  ;;  %v598_v32 = vpop.f32.mrb[15].mxu0  ;;  %1643 = vmatprep.subr.bf16.mxu0 %v1642_v24  ;;  %v1674_v33 = vpack.c.bf16 %v1812_v25, %v1804_v10 }
 0x10a   : > { %v1816_v34 = vpop.eup %1815  ;;  %1835 = vtanh.f32 %v754_v27  ;;  %v599_v35 = vadd.f32 %v598_v32, %v370_v26  ;;  %v757_v36 = vpop.f32.mrb[14].mxu1  ;;  %1645 = vmatpush1.bf16.msra.mxu0 %v1644_v20 }
 0x10b   : > { %v1818_v37 = vpop.eup %1817  ;;  %1837 = vtanh.f32 %v597_v31  ;;  %v758_v38 = vadd.f32 %v757_v36, %v370_v26  ;;  %v759_v39 = vpop.f32.mrb[15].mxu1  ;;  %1675 = vmatprep.subr.bf16.mxu1 %v1674_v33 }
 0x10c   : > { %v1820_v40 = vpop.eup %1819  ;;  %v375_v41 = vpop.permute.xlu0 %374  ;;  %1839 = vtanh.f32 %v599_v35  ;;  %v760_v42 = vadd.f32 %v759_v39, %v370_v26  ;;  %1677 = vmatpush1.bf16.msra.mxu1 %v1676_v29 }
 0x10d   : > { %v602_v43 = vpop.f32.mrb[16].mxu0  ;;  %v1822_v44 = vpop.eup %1821  ;;  %1841 = vtanh.f32 %v758_v38 }
 0x10e   : > { %v603_v45 = vadd.f32 %v602_v43, %v375_v41  ;;  %v604_v46 = vpop.f32.mrb[17].mxu0  ;;  %v1824_v47 = vpop.eup %1823  ;;  %1843 = vtanh.f32 %v760_v42  ;;  %v1648_v50 = vpack.c.bf16 %v1822_v44, %v1814_v30 }
 0x10f   : > { %v605_v48 = vadd.f32 %v604_v46, %v375_v41  ;;  %v763_v49 = vpop.f32.mrb[16].mxu1  ;;  %v1826_v51 = vpop.eup %1825  ;;  %v1646_v54 = vpack.c.bf16 %v1824_v47, %v1816_v34 }
 0x110   : > { %1845 = vtanh.f32 %v603_v45  ;;  %v764_v52 = vadd.f32 %v763_v49, %v375_v41  ;;  %v765_v53 = vpop.f32.mrb[17].mxu1  ;;  %v1828_v55 = vpop.eup %1827  ;;  %v1680_v59 = vpack.c.bf16 %v1826_v51, %v1818_v37 }
 0x111   : > { %v380_v56 = vpop.permute.xlu1 %379  ;;  %1847 = vtanh.f32 %v605_v48  ;;  %v766_v57 = vadd.f32 %v765_v53, %v375_v41  ;;  %v608_v58 = vpop.f32.mrb[18].mxu0  ;;  %1647 = vmatprep.subr.bf16.mxu0 %v1646_v54  ;;  %v1678_v63 = vpack.c.bf16 %v1828_v55, %v1820_v40 }
 0x112   : > { %v1830_v60 = vpop.eup %1829  ;;  %1849 = vtanh.f32 %v764_v52  ;;  %v609_v61 = vadd.f32 %v608_v58, %v380_v56  ;;  %v610_v62 = vpop.f32.mrb[19].mxu0  ;;  %1649 = vmatpush1.bf16.msra.mxu0 %v1648_v50 }
 0x113   : > { %v1832_v0 = vpop.eup %1831  ;;  %1851 = vtanh.f32 %v766_v57  ;;  %v611_v2 = vadd.f32 %v610_v62, %v380_v56  ;;  %v769_v3 = vpop.f32.mrb[18].mxu1  ;;  %1679 = vmatprep.subr.bf16.mxu1 %v1678_v63 }
 0x114   : > { %v1834_v6 = vpop.eup %1833  ;;  %1853 = vtanh.f32 %v609_v61  ;;  %v770_v7 = vadd.f32 %v769_v3, %v380_v56  ;;  %v771_v8 = vpop.f32.mrb[19].mxu1  ;;  %1681 = vmatpush1.bf16.msra.mxu1 %v1680_v59 }
 0x115   : > { %v1836_v9 = vpop.eup %1835  ;;  %v385_v10 = vpop.permute.xlu0 %384  ;;  %1855 = vtanh.f32 %v611_v2  ;;  %v772_v11 = vadd.f32 %v771_v8, %v380_v56 }
 0x116   : > { %v614_v12 = vpop.f32.mrb[20].mxu0  ;;  %v1838_v13 = vpop.eup %1837  ;;  %1857 = vtanh.f32 %v770_v7 }
 0x117   : > { %v615_v14 = vadd.f32 %v614_v12, %v385_v10  ;;  %v616_v15 = vpop.f32.mrb[21].mxu0  ;;  %v1840_v16 = vpop.eup %1839  ;;  %1859 = vtanh.f32 %v772_v11  ;;  %v1652_v19 = vpack.c.bf16 %v1838_v13, %v1830_v60 }
 0x118   : > { %v617_v17 = vadd.f32 %v616_v15, %v385_v10  ;;  %v775_v18 = vpop.f32.mrb[20].mxu1  ;;  %v1842_v20 = vpop.eup %1841  ;;  %v1650_v23 = vpack.c.bf16 %v1840_v16, %v1832_v0 }
 0x119   : > { %1861 = vtanh.f32 %v615_v14  ;;  %v776_v21 = vadd.f32 %v775_v18, %v385_v10  ;;  %v777_v22 = vpop.f32.mrb[21].mxu1  ;;  %v1844_v24 = vpop.eup %1843  ;;  %v1684_v28 = vpack.c.bf16 %v1842_v20, %v1834_v6 }
 0x11a   : > { %v390_v25 = vpop.permute.xlu1 %389  ;;  %1863 = vtanh.f32 %v617_v17  ;;  %v778_v26 = vadd.f32 %v777_v22, %v385_v10  ;;  %v620_v27 = vpop.f32.mrb[22].mxu0  ;;  %1651 = vmatprep.subr.bf16.mxu0 %v1650_v23  ;;  %v1682_v32 = vpack.c.bf16 %v1844_v24, %v1836_v9 }
 0x11b   : > { %v1846_v29 = vpop.eup %1845  ;;  %1865 = vtanh.f32 %v776_v21  ;;  %v621_v30 = vadd.f32 %v620_v27, %v390_v25  ;;  %v622_v31 = vpop.f32.mrb[23].mxu0  ;;  %1653 = vmatpush1.bf16.msra.mxu0 %v1652_v19 }
 0x11c   : > { %v1848_v33 = vpop.eup %1847  ;;  %1867 = vtanh.f32 %v778_v26  ;;  %v623_v34 = vadd.f32 %v622_v31, %v390_v25  ;;  %v781_v35 = vpop.f32.mrb[22].mxu1  ;;  %1683 = vmatprep.subr.bf16.mxu1 %v1682_v32 }
 0x11d   : > { %v1850_v36 = vpop.eup %1849  ;;  %1869 = vtanh.f32 %v621_v30  ;;  %v782_v37 = vadd.f32 %v781_v35, %v390_v25  ;;  %v783_v38 = vpop.f32.mrb[23].mxu1  ;;  %1685 = vmatpush1.bf16.msra.mxu1 %v1684_v28 }
 0x11e   : > { %v1852_v39 = vpop.eup %1851  ;;  %v395_v40 = vpop.permute.xlu0 %394  ;;  %1871 = vtanh.f32 %v623_v34  ;;  %v784_v41 = vadd.f32 %v783_v38, %v390_v25 }
 0x11f   : > { %v626_v42 = vpop.f32.mrb[24].mxu0  ;;  %v1854_v43 = vpop.eup %1853  ;;  %1873 = vtanh.f32 %v782_v37 }
 0x120   : > { %v627_v44 = vadd.f32 %v626_v42, %v395_v40  ;;  %v628_v45 = vpop.f32.mrb[25].mxu0  ;;  %v1856_v46 = vpop.eup %1855  ;;  %1875 = vtanh.f32 %v784_v41  ;;  %v1656_v49 = vpack.c.bf16 %v1854_v43, %v1846_v29 }
 0x121   : > { %v629_v47 = vadd.f32 %v628_v45, %v395_v40  ;;  %v787_v48 = vpop.f32.mrb[24].mxu1  ;;  %v1858_v50 = vpop.eup %1857  ;;  %v1654_v53 = vpack.c.bf16 %v1856_v46, %v1848_v33 }
 0x122   : > { %1877 = vtanh.f32 %v627_v44  ;;  %v788_v51 = vadd.f32 %v787_v48, %v395_v40  ;;  %v789_v52 = vpop.f32.mrb[25].mxu1  ;;  %v1860_v54 = vpop.eup %1859  ;;  %v1688_v58 = vpack.c.bf16 %v1858_v50, %v1850_v36 }
 0x123   : > { %v400_v55 = vpop.permute.xlu1 %399  ;;  %1879 = vtanh.f32 %v629_v47  ;;  %v790_v56 = vadd.f32 %v789_v52, %v395_v40  ;;  %v632_v57 = vpop.f32.mrb[26].mxu0  ;;  %1655 = vmatprep.subr.bf16.mxu0 %v1654_v53  ;;  %v1686_v62 = vpack.c.bf16 %v1860_v54, %v1852_v39 }
 0x124   : > { %v1862_v59 = vpop.eup %1861  ;;  %1881 = vtanh.f32 %v788_v51  ;;  %v633_v60 = vadd.f32 %v632_v57, %v400_v55  ;;  %v634_v61 = vpop.f32.mrb[27].mxu0  ;;  %1657 = vmatpush1.bf16.msra.mxu0 %v1656_v49 }
 0x125   : > { %v1864_v63 = vpop.eup %1863  ;;  %1883 = vtanh.f32 %v790_v56  ;;  %v635_v0 = vadd.f32 %v634_v61, %v400_v55  ;;  %v793_v2 = vpop.f32.mrb[26].mxu1  ;;  %1687 = vmatprep.subr.bf16.mxu1 %v1686_v62  ;;  %v875_v61 = vld [vmem:[%s2420_s3 + $0x8] sm:$0xff]  ;;  %v876_v62 = vld [vmem:[%s2420_s3 + $0x10] sm:$0xff] }
 0x126   : > { %v1866_v3 = vpop.eup %1865  ;;  %1885 = vtanh.f32 %v633_v60  ;;  %v794_v6 = vadd.f32 %v793_v2, %v400_v55  ;;  %v795_v7 = vpop.f32.mrb[27].mxu1  ;;  %1689 = vmatpush1.bf16.msra.mxu1 %v1688_v58  ;;  %v874_v60 = vld [vmem:[%s2420_s3] sm:$0xff]  ;;  %v879_v2 = vld [vmem:[%s2420_s3 + $0x28] sm:$0xff] }
 0x127   : > { %v1868_v8 = vpop.eup %1867  ;;  %v405_v9 = vpop.permute.xlu0 %404  ;;  %1887 = vtanh.f32 %v635_v0  ;;  %v796_v10 = vadd.f32 %v795_v7, %v400_v55  ;;  %v878_v0 = vld [vmem:[%s2420_s3 + $0x20] sm:$0xff] }
 0x128   : > { %v638_v11 = vpop.f32.mrb[28].mxu0  ;;  %v1870_v12 = vpop.eup %1869  ;;  %1889 = vtanh.f32 %v794_v6  ;;  %v881_v6 = vld [vmem:[%s2420_s3 + $0x38] sm:$0xff]  ;;  %v882_v7 = vld [vmem:[%s2420_s3 + $0x40] sm:$0xff] }
 0x129   : > { %v639_v13 = vadd.f32 %v638_v11, %v405_v9  ;;  %v640_v14 = vpop.f32.mrb[29].mxu0  ;;  %v1872_v15 = vpop.eup %1871  ;;  %1891 = vtanh.f32 %v796_v10  ;;  %v1660_v18 = vpack.c.bf16 %v1870_v12, %v1862_v59  ;;  %v885_v10 = vld [vmem:[%s2420_s3 + $0x58] sm:$0xff]  ;;  %v886_v11 = vld [vmem:[%s2420_s3 + $0x60] sm:$0xff]  ;;  %v887_v12 = vld [vmem:[%s2420_s3 + $0x68] sm:$0xff] }
 0x12a   : > { %v641_v16 = vadd.f32 %v640_v14, %v405_v9  ;;  %v799_v17 = vpop.f32.mrb[28].mxu1  ;;  %v1874_v19 = vpop.eup %1873  ;;  %v1658_v22 = vpack.c.bf16 %v1872_v15, %v1864_v63  ;;  %v877_v63 = vld [vmem:[%s2420_s3 + $0x18] sm:$0xff] }
 0x12b   : > { %1893 = vtanh.f32 %v639_v13  ;;  %v800_v20 = vadd.f32 %v799_v17, %v405_v9  ;;  %v801_v21 = vpop.f32.mrb[29].mxu1  ;;  %v1876_v23 = vpop.eup %1875  ;;  %v1692_v27 = vpack.c.bf16 %v1874_v19, %v1866_v3  ;;  %v880_v3 = vld [vmem:[%s2420_s3 + $0x30] sm:$0xff]  ;;  %v889_v14 = vld [vmem:[%s2420_s3 + $0x78] sm:$0xff] }
 0x12c   : > { %v410_v24 = vpop.permute.xlu1 %409  ;;  %1895 = vtanh.f32 %v641_v16  ;;  %v802_v25 = vadd.f32 %v801_v21, %v405_v9  ;;  %v644_v26 = vpop.f32.mrb[30].mxu0  ;;  %1659 = vmatprep.subr.bf16.mxu0 %v1658_v22  ;;  %v1690_v31 = vpack.c.bf16 %v1876_v23, %v1868_v8  ;;  %v883_v8 = vld [vmem:[%s2420_s3 + $0x48] sm:$0xff]  ;;  %v884_v9 = vld [vmem:[%s2420_s3 + $0x50] sm:$0xff] }
 0x12d   : > { %v1878_v28 = vpop.eup %1877  ;;  %1897 = vtanh.f32 %v800_v20  ;;  %v645_v29 = vadd.f32 %v644_v26, %v410_v24  ;;  %v646_v30 = vpop.f32.mrb[31].mxu0  ;;  %1661 = vmatpush1.bf16.msra.mxu0 %v1660_v18  ;;  %v888_v13 = vld [vmem:[%s2420_s3 + $0x70] sm:$0xff] }
 0x12e   : > { %v1880_v32 = vpop.eup %1879  ;;  %1899 = vtanh.f32 %v802_v25  ;;  %v647_v33 = vadd.f32 %v646_v30, %v410_v24  ;;  %v805_v34 = vpop.f32.mrb[30].mxu1  ;;  %1691 = vmatprep.subr.bf16.mxu1 %v1690_v31 }
 0x12f   : > { %v1882_v35 = vpop.eup %1881  ;;  %1901 = vtanh.f32 %v645_v29  ;;  %v806_v36 = vadd.f32 %v805_v34, %v410_v24  ;;  %v807_v37 = vpop.f32.mrb[31].mxu1  ;;  %1693 = vmatpush1.bf16.msra.mxu1 %v1692_v27 }
 0x130   : > { %v1884_v38 = vpop.eup %1883  ;;  %1903 = vtanh.f32 %v647_v33  ;;  %v808_v39 = vadd.f32 %v807_v37, %v410_v24  ;;  %v893_v15 = vpop.permute.xlu0 %892 }
 0x131   : > { %v1886_v40 = vpop.eup %1885  ;;  %1905 = vtanh.f32 %v806_v36  ;;  %v898_v23 = vpop.permute.xlu1 %897 }
 0x132   : > { %v1888_v41 = vpop.eup %1887  ;;  %1907 = vtanh.f32 %v808_v39  ;;  %v1664_v42 = vpack.c.bf16 %v1886_v40, %v1878_v28 }
 0x133   : > { %v1890_v43 = vpop.eup %1889  ;;  %v1662_v44 = vpack.c.bf16 %v1888_v41, %v1880_v32 }
 0x134   : > { %v1892_v45 = vpop.eup %1891  ;;  %v1696_v46 = vpack.c.bf16 %v1890_v43, %v1882_v35  ;;  %v903_v31 = vpop.permute.xlu0 %902 }
 0x135   : > { %v1894_v47 = vpop.eup %1893  ;;  %1663 = vmatprep.subr.bf16.mxu0 %v1662_v44  ;;  %v1694_v48 = vpack.c.bf16 %v1892_v45, %v1884_v38  ;;  %v908_v40 = vpop.permute.xlu1 %907 }
 0x136   : > { %v1896_v49 = vpop.eup %1895  ;;  %1665 = vmatpush1.bf16.msra.mxu0 %v1664_v42 }
 0x137   : > { %v1898_v50 = vpop.eup %1897  ;;  %1695 = vmatprep.subr.bf16.mxu1 %v1694_v48 }
 0x138   : > { %v1900_v51 = vpop.eup %1899  ;;  %1697 = vmatpush1.bf16.msra.mxu1 %v1696_v46 }
 0x139   : > { %v1902_v52 = vpop.eup %1901 }
 0x13a   : > { %v1904_v53 = vpop.eup %1903  ;;  %v1668_v54 = vpack.c.bf16 %v1902_v52, %v1894_v47 }
 0x13b   : > { %v1906_v55 = vpop.eup %1905  ;;  %v1666_v56 = vpack.c.bf16 %v1904_v53, %v1896_v49  ;;  %v913_v53 = vpop.permute.xlu0 %912 }
 0x13c   : > { %v1908_v57 = vpop.eup %1907  ;;  %v1700_v58 = vpack.c.bf16 %v1906_v55, %v1898_v50 }
 0x13d   : > { %1667 = vmatprep.subr.bf16.mxu0 %v1666_v56  ;;  %v1698_v59 = vpack.c.bf16 %v1908_v57, %v1900_v51 }
 0x13e   : > { %1669 = vmatpush1.bf16.msra.mxu0 %v1668_v54 }
 0x13f   : > { %1699 = vmatprep.subr.bf16.mxu1 %v1698_v59 }
 0x140   : > { %1701 = vmatpush1.bf16.msra.mxu1 %v1700_v58 }
 0x141   : > { %1035 = vmatmul.mubr.f32.vlgmr.msra.gmra.mrb[32].mxu0 %v874_v60 }
 0x142   : > { %1040 = vmatprep.mubr.f32.mxu0 %v2046_v4 }
 0x143   : > { %1196 = vmatmul.mubr.f32.vlgmr.msra.gmra.mrb[32].mxu1 %v874_v60 }
 0x144   : > { %1201 = vmatprep.mubr.f32.mxu1 %v2046_v4 }
 0x145   : > { %1041 = vmatmul.mubr.f32.gmra.mrb[34].mxu0 %v875_v61 }
 0x146   : > { %1046 = vmatprep.mubr.f32.mxu0 %v2046_v4 }
 0x147   : > { %1202 = vmatmul.mubr.f32.gmra.mrb[34].mxu1 %v875_v61 }
 0x148   : > { %1207 = vmatprep.mubr.f32.mxu1 %v2046_v4 }
 0x149   : > { %1047 = vmatmul.mubr.f32.gmra.mrb[36].mxu0 %v876_v62 }
 0x14a   : > { %1052 = vmatprep.mubr.f32.mxu0 %v2046_v4 }
 0x14b   : > { %1208 = vmatmul.mubr.f32.gmra.mrb[36].mxu1 %v876_v62 }
 0x14c   : > { %1213 = vmatprep.mubr.f32.mxu1 %v2046_v4 }
 0x14d   : > { %1053 = vmatmul.mubr.f32.gmra.mrb[38].mxu0 %v877_v63 }
 0x14e   : > { %1058 = vmatprep.mubr.f32.mxu0 %v2046_v4 }
 0x14f   : > { %1214 = vmatmul.mubr.f32.gmra.mrb[38].mxu1 %v877_v63 }
 0x150   : > { %1219 = vmatprep.mubr.f32.mxu1 %v2046_v4 }
 0x151   : > { %1059 = vmatmul.mubr.f32.gmra.mrb[40].mxu0 %v878_v0 }
 0x152   : > { %1064 = vmatprep.mubr.f32.mxu0 %v2046_v4 }
 0x153   : > { %1220 = vmatmul.mubr.f32.gmra.mrb[40].mxu1 %v878_v0 }
 0x154   : > { %1225 = vmatprep.mubr.f32.mxu1 %v2046_v4 }
 0x155   : > { %1065 = vmatmul.mubr.f32.gmra.mrb[42].mxu0 %v879_v2 }
 0x156   : > { %1070 = vmatprep.mubr.f32.mxu0 %v2046_v4 }
 0x157   : > { %1226 = vmatmul.mubr.f32.gmra.mrb[42].mxu1 %v879_v2 }
 0x158   : > { %1231 = vmatprep.mubr.f32.mxu1 %v2046_v4 }
 0x159   : > { %1071 = vmatmul.mubr.f32.gmra.mrb[44].mxu0 %v880_v3 }
 0x15a   : > { %1076 = vmatprep.mubr.f32.mxu0 %v2046_v4 }
 0x15b   : > { %1232 = vmatmul.mubr.f32.gmra.mrb[44].mxu1 %v880_v3 }
 0x15c   : > { %1237 = vmatprep.mubr.f32.mxu1 %v2046_v4 }
 0x15d   : > { %1077 = vmatmul.mubr.f32.gmra.mrb[46].mxu0 %v881_v6 }
 0x15e   : > { %1082 = vmatprep.mubr.f32.mxu0 %v2046_v4 }
 0x15f   : > { %1238 = vmatmul.mubr.f32.gmra.mrb[46].mxu1 %v881_v6 }
 0x160   : > { %1243 = vmatprep.mubr.f32.mxu1 %v2046_v4 }
 0x161   : > { %1083 = vmatmul.mubr.f32.gmra.mrb[48].mxu0 %v882_v7 }
 0x162   : > { %1088 = vmatprep.mubr.f32.mxu0 %v2046_v4 }
 0x163   : > { %1244 = vmatmul.mubr.f32.gmra.mrb[48].mxu1 %v882_v7  ;;  %v918_v7 = vpop.permute.xlu1 %917 }
 0x164   : > { %1249 = vmatprep.mubr.f32.mxu1 %v2046_v4 }
 0x165   : > { %1089 = vmatmul.mubr.f32.gmra.mrb[50].mxu0 %v883_v8 }
 0x166   : > { %1094 = vmatprep.mubr.f32.mxu0 %v2046_v4 }
 0x167   : > { %1250 = vmatmul.mubr.f32.gmra.mrb[50].mxu1 %v883_v8 }
 0x168   : > { %1255 = vmatprep.mubr.f32.mxu1 %v2046_v4 }
 0x169   : > { %1095 = vmatmul.mubr.f32.gmra.mrb[52].mxu0 %v884_v9 }
 0x16a   : > { %1100 = vmatprep.mubr.f32.mxu0 %v2046_v4 }
 0x16b   : > { %1256 = vmatmul.mubr.f32.gmra.mrb[52].mxu1 %v884_v9 }
 0x16c   : > { %1261 = vmatprep.mubr.f32.mxu1 %v2046_v4 }
 0x16d   : > { %1101 = vmatmul.mubr.f32.gmra.mrb[54].mxu0 %v885_v10 }
 0x16e   : > { %1106 = vmatprep.mubr.f32.mxu0 %v2046_v4 }
 0x16f   : > { %1262 = vmatmul.mubr.f32.gmra.mrb[54].mxu1 %v885_v10 }
 0x170   : > { %1267 = vmatprep.mubr.f32.mxu1 %v2046_v4 }
 0x171   : > { %1107 = vmatmul.mubr.f32.gmra.mrb[56].mxu0 %v886_v11 }
 0x172   : > { %1112 = vmatprep.mubr.f32.mxu0 %v2046_v4 }
 0x173   : > { %1268 = vmatmul.mubr.f32.gmra.mrb[56].mxu1 %v886_v11 }
 0x174   : > { %1273 = vmatprep.mubr.f32.mxu1 %v2046_v4 }
 0x175   : > { %1113 = vmatmul.mubr.f32.gmra.mrb[58].mxu0 %v887_v12 }
 0x176   : > { %1118 = vmatprep.mubr.f32.mxu0 %v2046_v4 }
 0x177   : > { %1274 = vmatmul.mubr.f32.gmra.mrb[58].mxu1 %v887_v12 }
 0x178   : > { %1279 = vmatprep.mubr.f32.mxu1 %v2046_v4 }
 0x179   : > { %1119 = vmatmul.mubr.f32.gmra.mrb[60].mxu0 %v888_v13 }
 0x17a   : > { %1124 = vmatprep.mubr.f32.mxu0 %v2046_v4 }
 0x17b   : > { %1280 = vmatmul.mubr.f32.gmra.mrb[60].mxu1 %v888_v13 }
 0x17c   : > { %1285 = vmatprep.mubr.f32.mxu1 %v2046_v4 }
 0x17d   : > { %1125 = vmatmul.mubr.f32.gmra.mrb[62].mxu0 %v889_v14 }
 0x17e   : > { %1430 = vmatprep.mubr.f32.mxu0 %v2046_v4 }
 0x17f   : > { %1286 = vmatmul.mubr.f32.gmra.mrb[62].mxu1 %v889_v14 }
 0x180   : > { %1501 = vmatprep.mubr.f32.mxu1 %v2046_v4 }
 0x214   : > { %v1036_v16 = vpop.f32.mrb[32].mxu0 }
 0x215   : > { %v1037_v17 = vadd.f32 %v1036_v16, %v893_v15  ;;  %v1038_v18 = vpop.f32.mrb[33].mxu0 }
 0x216   : > { %v1039_v19 = vadd.f32 %v1038_v18, %v893_v15  ;;  %v1197_v20 = vpop.f32.mrb[32].mxu1 }
 0x217   : > { %1909 = vtanh.f32 %v1037_v17  ;;  %v1198_v21 = vadd.f32 %v1197_v20, %v893_v15  ;;  %v1199_v22 = vpop.f32.mrb[33].mxu1 }
 0x218   : > { %1911 = vtanh.f32 %v1039_v19  ;;  %v1200_v24 = vadd.f32 %v1199_v22, %v893_v15  ;;  %v1042_v25 = vpop.f32.mrb[34].mxu0  ;;  %v923_v22 = vpop.permute.xlu0 %922 }
 0x219   : > { %1913 = vtanh.f32 %v1198_v21  ;;  %v1043_v26 = vadd.f32 %v1042_v25, %v898_v23  ;;  %v1044_v27 = vpop.f32.mrb[35].mxu0 }
 0x21a   : > { %1915 = vtanh.f32 %v1200_v24  ;;  %v1045_v28 = vadd.f32 %v1044_v27, %v898_v23  ;;  %v1203_v29 = vpop.f32.mrb[34].mxu1 }
 0x21b   : > { %1917 = vtanh.f32 %v1043_v26  ;;  %v1204_v4 = vadd.f32 %v1203_v29, %v898_v23  ;;  %v1205_v30 = vpop.f32.mrb[35].mxu1 }
 0x21c   : > { %1919 = vtanh.f32 %v1045_v28  ;;  %v1206_v32 = vadd.f32 %v1205_v30, %v898_v23  ;;  %v1048_v33 = vpop.f32.mrb[36].mxu0 }
 0x21d   : > { %1921 = vtanh.f32 %v1204_v4  ;;  %v1049_v34 = vadd.f32 %v1048_v33, %v903_v31  ;;  %v1050_v35 = vpop.f32.mrb[37].mxu0 }
 0x21e   : > { %1923 = vtanh.f32 %v1206_v32  ;;  %v1051_v36 = vadd.f32 %v1050_v35, %v903_v31  ;;  %v1209_v37 = vpop.f32.mrb[36].mxu1 }
 0x21f   : > { %1925 = vtanh.f32 %v1049_v34  ;;  %v1210_v38 = vadd.f32 %v1209_v37, %v903_v31  ;;  %v1211_v39 = vpop.f32.mrb[37].mxu1 }
 0x220   : > { %1927 = vtanh.f32 %v1051_v36  ;;  %v1212_v41 = vadd.f32 %v1211_v39, %v903_v31  ;;  %v1054_v42 = vpop.f32.mrb[38].mxu0  ;;  %v928_v36 = vpop.permute.xlu1 %927 }
 0x221   : > { %v1910_v43 = vpop.eup %1909  ;;  %1929 = vtanh.f32 %v1210_v38  ;;  %v1055_v44 = vadd.f32 %v1054_v42, %v908_v40  ;;  %v1056_v45 = vpop.f32.mrb[39].mxu0 }
 0x222   : > { %v1912_v46 = vpop.eup %1911  ;;  %1931 = vtanh.f32 %v1212_v41  ;;  %v1057_v47 = vadd.f32 %v1056_v45, %v908_v40  ;;  %v1215_v48 = vpop.f32.mrb[38].mxu1 }
 0x223   : > { %v1914_v49 = vpop.eup %1913  ;;  %1933 = vtanh.f32 %v1055_v44  ;;  %v1216_v50 = vadd.f32 %v1215_v48, %v908_v40  ;;  %v1217_v51 = vpop.f32.mrb[39].mxu1 }
 0x224   : > { %v1916_v52 = vpop.eup %1915  ;;  %1935 = vtanh.f32 %v1057_v47  ;;  %v1218_v54 = vadd.f32 %v1217_v51, %v908_v40  ;;  %v1060_v55 = vpop.f32.mrb[40].mxu0 }
 0x225   : > { %v1918_v56 = vpop.eup %1917  ;;  %1937 = vtanh.f32 %v1216_v50  ;;  %v1061_v57 = vadd.f32 %v1060_v55, %v913_v53  ;;  %v1062_v58 = vpop.f32.mrb[41].mxu0 }
 0x226   : > { %v1920_v59 = vpop.eup %1919  ;;  %1939 = vtanh.f32 %v1218_v54  ;;  %v1063_v60 = vadd.f32 %v1062_v58, %v913_v53  ;;  %v1221_v61 = vpop.f32.mrb[40].mxu1  ;;  %v1704_v62 = vpack.c.bf16 %v1918_v56, %v1910_v43 }
 0x227   : > { %v1922_v63 = vpop.eup %1921  ;;  %1941 = vtanh.f32 %v1061_v57  ;;  %v1222_v0 = vadd.f32 %v1221_v61, %v913_v53  ;;  %v1223_v2 = vpop.f32.mrb[41].mxu1  ;;  %v1702_v3 = vpack.c.bf16 %v1920_v59, %v1912_v46 }
 0x228   : > { %v1924_v6 = vpop.eup %1923  ;;  %1943 = vtanh.f32 %v1063_v60  ;;  %v1224_v8 = vadd.f32 %v1223_v2, %v913_v53  ;;  %v1066_v9 = vpop.f32.mrb[42].mxu0  ;;  %v1736_v10 = vpack.c.bf16 %v1922_v63, %v1914_v49 }
 0x229   : > { %v1926_v11 = vpop.eup %1925  ;;  %1945 = vtanh.f32 %v1222_v0  ;;  %v1067_v12 = vadd.f32 %v1066_v9, %v918_v7  ;;  %v1068_v13 = vpop.f32.mrb[43].mxu0  ;;  %1703 = vmatprep.subr.bf16.mxu0 %v1702_v3  ;;  %v1734_v14 = vpack.c.bf16 %v1924_v6, %v1916_v52 }
 0x22a   : > { %v1928_v15 = vpop.eup %1927  ;;  %1947 = vtanh.f32 %v1224_v8  ;;  %v1069_v16 = vadd.f32 %v1068_v13, %v918_v7  ;;  %v1227_v17 = vpop.f32.mrb[42].mxu1  ;;  %1705 = vmatpush1.bf16.msra.mxu0 %v1704_v62 }
 0x22b   : > { %v1930_v18 = vpop.eup %1929  ;;  %1949 = vtanh.f32 %v1067_v12  ;;  %v1228_v19 = vadd.f32 %v1227_v17, %v918_v7  ;;  %v1229_v20 = vpop.f32.mrb[43].mxu1  ;;  %1735 = vmatprep.subr.bf16.mxu1 %v1734_v14 }
 0x22c   : > { %v1932_v21 = vpop.eup %1931  ;;  %1951 = vtanh.f32 %v1069_v16  ;;  %v1230_v23 = vadd.f32 %v1229_v20, %v918_v7  ;;  %v1072_v24 = vpop.f32.mrb[44].mxu0  ;;  %1737 = vmatpush1.bf16.msra.mxu1 %v1736_v10 }
 0x22d   : > { %v1934_v25 = vpop.eup %1933  ;;  %1953 = vtanh.f32 %v1228_v19  ;;  %v1073_v26 = vadd.f32 %v1072_v24, %v923_v22  ;;  %v1074_v27 = vpop.f32.mrb[45].mxu0 }
 0x22e   : > { %v1936_v28 = vpop.eup %1935  ;;  %1955 = vtanh.f32 %v1230_v23  ;;  %v1075_v29 = vadd.f32 %v1074_v27, %v923_v22  ;;  %v1233_v4 = vpop.f32.mrb[44].mxu1  ;;  %v1708_v30 = vpack.c.bf16 %v1934_v25, %v1926_v11 }
 0x22f   : > { %v1938_v31 = vpop.eup %1937  ;;  %1957 = vtanh.f32 %v1073_v26  ;;  %v1234_v32 = vadd.f32 %v1233_v4, %v923_v22  ;;  %v1235_v33 = vpop.f32.mrb[45].mxu1  ;;  %v1706_v34 = vpack.c.bf16 %v1936_v28, %v1928_v15 }
 0x230   : > { %v1940_v35 = vpop.eup %1939  ;;  %1959 = vtanh.f32 %v1075_v29  ;;  %v1236_v37 = vadd.f32 %v1235_v33, %v923_v22  ;;  %v1078_v38 = vpop.f32.mrb[46].mxu0  ;;  %v1740_v39 = vpack.c.bf16 %v1938_v31, %v1930_v18 }
 0x231   : > { %v1942_v40 = vpop.eup %1941  ;;  %1961 = vtanh.f32 %v1234_v32  ;;  %v1079_v41 = vadd.f32 %v1078_v38, %v928_v36  ;;  %v1080_v42 = vpop.f32.mrb[47].mxu0  ;;  %1707 = vmatprep.subr.bf16.mxu0 %v1706_v34  ;;  %v1738_v43 = vpack.c.bf16 %v1940_v35, %v1932_v21 }
 0x232   : > { %v1944_v44 = vpop.eup %1943  ;;  %1963 = vtanh.f32 %v1236_v37  ;;  %v1081_v45 = vadd.f32 %v1080_v42, %v928_v36  ;;  %v1239_v46 = vpop.f32.mrb[46].mxu1  ;;  %1709 = vmatpush1.bf16.msra.mxu0 %v1708_v30 }
 0x233   : > { %v1946_v47 = vpop.eup %1945  ;;  %1965 = vtanh.f32 %v1079_v41  ;;  %v1240_v48 = vadd.f32 %v1239_v46, %v928_v36  ;;  %v1241_v49 = vpop.f32.mrb[47].mxu1  ;;  %1739 = vmatprep.subr.bf16.mxu1 %v1738_v43 }
 0x234   : > { %v1948_v50 = vpop.eup %1947  ;;  %v933_v51 = vpop.permute.xlu0 %932  ;;  %1967 = vtanh.f32 %v1081_v45  ;;  %v1242_v52 = vadd.f32 %v1241_v49, %v928_v36  ;;  %1741 = vmatpush1.bf16.msra.mxu1 %v1740_v39 }
 0x235   : > { %v1084_v53 = vpop.f32.mrb[48].mxu0  ;;  %v1950_v54 = vpop.eup %1949  ;;  %1969 = vtanh.f32 %v1240_v48 }
 0x236   : > { %v1085_v55 = vadd.f32 %v1084_v53, %v933_v51  ;;  %v1086_v56 = vpop.f32.mrb[49].mxu0  ;;  %v1952_v57 = vpop.eup %1951  ;;  %1971 = vtanh.f32 %v1242_v52  ;;  %v1712_v60 = vpack.c.bf16 %v1950_v54, %v1942_v40 }
 0x237   : > { %v1087_v58 = vadd.f32 %v1086_v56, %v933_v51  ;;  %v1245_v59 = vpop.f32.mrb[48].mxu1  ;;  %v1954_v61 = vpop.eup %1953  ;;  %v1710_v0 = vpack.c.bf16 %v1952_v57, %v1944_v44 }
 0x238   : > { %1973 = vtanh.f32 %v1085_v55  ;;  %v1246_v62 = vadd.f32 %v1245_v59, %v933_v51  ;;  %v1247_v63 = vpop.f32.mrb[49].mxu1  ;;  %v1956_v2 = vpop.eup %1955  ;;  %v1744_v8 = vpack.c.bf16 %v1954_v61, %v1946_v47 }
 0x239   : > { %v938_v3 = vpop.permute.xlu1 %937  ;;  %1975 = vtanh.f32 %v1087_v58  ;;  %v1248_v6 = vadd.f32 %v1247_v63, %v933_v51  ;;  %v1090_v7 = vpop.f32.mrb[50].mxu0  ;;  %1711 = vmatprep.subr.bf16.mxu0 %v1710_v0  ;;  %v1742_v12 = vpack.c.bf16 %v1956_v2, %v1948_v50 }
 0x23a   : > { %v1958_v9 = vpop.eup %1957  ;;  %1977 = vtanh.f32 %v1246_v62  ;;  %v1091_v10 = vadd.f32 %v1090_v7, %v938_v3  ;;  %v1092_v11 = vpop.f32.mrb[51].mxu0  ;;  %1713 = vmatpush1.bf16.msra.mxu0 %v1712_v60 }
 0x23b   : > { %v1960_v13 = vpop.eup %1959  ;;  %1979 = vtanh.f32 %v1248_v6  ;;  %v1093_v14 = vadd.f32 %v1092_v11, %v938_v3  ;;  %v1251_v15 = vpop.f32.mrb[50].mxu1  ;;  %1743 = vmatprep.subr.bf16.mxu1 %v1742_v12 }
 0x23c   : > { %v1962_v16 = vpop.eup %1961  ;;  %1981 = vtanh.f32 %v1091_v10  ;;  %v1252_v17 = vadd.f32 %v1251_v15, %v938_v3  ;;  %v1253_v18 = vpop.f32.mrb[51].mxu1  ;;  %1745 = vmatpush1.bf16.msra.mxu1 %v1744_v8 }
 0x23d   : > { %v1964_v19 = vpop.eup %1963  ;;  %v943_v20 = vpop.permute.xlu0 %942  ;;  %1983 = vtanh.f32 %v1093_v14  ;;  %v1254_v21 = vadd.f32 %v1253_v18, %v938_v3 }
 0x23e   : > { %v1096_v22 = vpop.f32.mrb[52].mxu0  ;;  %v1966_v23 = vpop.eup %1965  ;;  %1985 = vtanh.f32 %v1252_v17 }
 0x23f   : > { %v1097_v24 = vadd.f32 %v1096_v22, %v943_v20  ;;  %v1098_v25 = vpop.f32.mrb[53].mxu0  ;;  %v1968_v26 = vpop.eup %1967  ;;  %1987 = vtanh.f32 %v1254_v21  ;;  %v1716_v29 = vpack.c.bf16 %v1966_v23, %v1958_v9 }
 0x240   : > { %v1099_v27 = vadd.f32 %v1098_v25, %v943_v20  ;;  %v1257_v28 = vpop.f32.mrb[52].mxu1  ;;  %v1970_v4 = vpop.eup %1969  ;;  %v1714_v32 = vpack.c.bf16 %v1968_v26, %v1960_v13 }
 0x241   : > { %1989 = vtanh.f32 %v1097_v24  ;;  %v1258_v30 = vadd.f32 %v1257_v28, %v943_v20  ;;  %v1259_v31 = vpop.f32.mrb[53].mxu1  ;;  %v1972_v33 = vpop.eup %1971  ;;  %v1748_v37 = vpack.c.bf16 %v1970_v4, %v1962_v16 }
 0x242   : > { %v948_v34 = vpop.permute.xlu1 %947  ;;  %1991 = vtanh.f32 %v1099_v27  ;;  %v1260_v35 = vadd.f32 %v1259_v31, %v943_v20  ;;  %v1102_v36 = vpop.f32.mrb[54].mxu0  ;;  %1715 = vmatprep.subr.bf16.mxu0 %v1714_v32  ;;  %v1746_v41 = vpack.c.bf16 %v1972_v33, %v1964_v19 }
 0x243   : > { %v1974_v38 = vpop.eup %1973  ;;  %1993 = vtanh.f32 %v1258_v30  ;;  %v1103_v39 = vadd.f32 %v1102_v36, %v948_v34  ;;  %v1104_v40 = vpop.f32.mrb[55].mxu0  ;;  %1717 = vmatpush1.bf16.msra.mxu0 %v1716_v29 }
 0x244   : > { %v1976_v42 = vpop.eup %1975  ;;  %1995 = vtanh.f32 %v1260_v35  ;;  %v1105_v43 = vadd.f32 %v1104_v40, %v948_v34  ;;  %v1263_v44 = vpop.f32.mrb[54].mxu1  ;;  %1747 = vmatprep.subr.bf16.mxu1 %v1746_v41 }
 0x245   : > { %v1978_v45 = vpop.eup %1977  ;;  %1997 = vtanh.f32 %v1103_v39  ;;  %v1264_v46 = vadd.f32 %v1263_v44, %v948_v34  ;;  %v1265_v47 = vpop.f32.mrb[55].mxu1  ;;  %1749 = vmatpush1.bf16.msra.mxu1 %v1748_v37 }
 0x246   : > { %v1980_v48 = vpop.eup %1979  ;;  %v953_v49 = vpop.permute.xlu0 %952  ;;  %1999 = vtanh.f32 %v1105_v43  ;;  %v1266_v50 = vadd.f32 %v1265_v47, %v948_v34 }
 0x247   : > { %v1108_v51 = vpop.f32.mrb[56].mxu0  ;;  %v1982_v52 = vpop.eup %1981  ;;  %2001 = vtanh.f32 %v1264_v46 }
 0x248   : > { %v1109_v53 = vadd.f32 %v1108_v51, %v953_v49  ;;  %v1110_v54 = vpop.f32.mrb[57].mxu0  ;;  %v1984_v55 = vpop.eup %1983  ;;  %2003 = vtanh.f32 %v1266_v50  ;;  %v1720_v58 = vpack.c.bf16 %v1982_v52, %v1974_v38 }
 0x249   : > { %v1111_v56 = vadd.f32 %v1110_v54, %v953_v49  ;;  %v1269_v57 = vpop.f32.mrb[56].mxu1  ;;  %v1986_v59 = vpop.eup %1985  ;;  %v1718_v62 = vpack.c.bf16 %v1984_v55, %v1976_v42 }
 0x24a   : > { %2005 = vtanh.f32 %v1109_v53  ;;  %v1270_v60 = vadd.f32 %v1269_v57, %v953_v49  ;;  %v1271_v61 = vpop.f32.mrb[57].mxu1  ;;  %v1988_v63 = vpop.eup %1987  ;;  %v1752_v6 = vpack.c.bf16 %v1986_v59, %v1978_v45 }
 0x24b   : > { %v958_v0 = vpop.permute.xlu1 %957  ;;  %2007 = vtanh.f32 %v1111_v56  ;;  %v1272_v2 = vadd.f32 %v1271_v61, %v953_v49  ;;  %v1114_v3 = vpop.f32.mrb[58].mxu0  ;;  %1719 = vmatprep.subr.bf16.mxu0 %v1718_v62  ;;  %v1750_v10 = vpack.c.bf16 %v1988_v63, %v1980_v48 }
 0x24c   : > { %v1990_v7 = vpop.eup %1989  ;;  %2009 = vtanh.f32 %v1270_v60  ;;  %v1115_v8 = vadd.f32 %v1114_v3, %v958_v0  ;;  %v1116_v9 = vpop.f32.mrb[59].mxu0  ;;  %1721 = vmatpush1.bf16.msra.mxu0 %v1720_v58 }
 0x24d   : > { %v1992_v11 = vpop.eup %1991  ;;  %2011 = vtanh.f32 %v1272_v2  ;;  %v1117_v12 = vadd.f32 %v1116_v9, %v958_v0  ;;  %v1275_v13 = vpop.f32.mrb[58].mxu1  ;;  %1751 = vmatprep.subr.bf16.mxu1 %v1750_v10  ;;  %v2048_v10 = vmov 1966171168  }
 0x24e   : > { %v1994_v14 = vpop.eup %1993  ;;  %2013 = vtanh.f32 %v1115_v8  ;;  %v1276_v15 = vadd.f32 %v1275_v13, %v958_v0  ;;  %v1277_v16 = vpop.f32.mrb[59].mxu1  ;;  %1753 = vmatpush1.bf16.msra.mxu1 %v1752_v6  ;;  %v1364_v8 = vsub.s32 0, %v2103_v5 }
 0x24f   : > { %v1996_v17 = vpop.eup %1995  ;;  %v963_v18 = vpop.permute.xlu0 %962  ;;  %2015 = vtanh.f32 %v1117_v12  ;;  %v1278_v19 = vadd.f32 %v1277_v16, %v958_v0 }
 0x250   : > { %v1120_v20 = vpop.f32.mrb[60].mxu0  ;;  %v1998_v21 = vpop.eup %1997  ;;  %2017 = vtanh.f32 %v1276_v15 }
 0x251   : > { %v1121_v22 = vadd.f32 %v1120_v20, %v963_v18  ;;  %v1122_v23 = vpop.f32.mrb[61].mxu0  ;;  %v2000_v24 = vpop.eup %1999  ;;  %2019 = vtanh.f32 %v1278_v19  ;;  %v1724_v27 = vpack.c.bf16 %v1998_v21, %v1990_v7  ;;  %v1356_v7 = vld [vmem:[%s2422_s5] sm:$0x1] }
 0x252   : > { %v1123_v25 = vadd.f32 %v1122_v23, %v963_v18  ;;  %v1281_v26 = vpop.f32.mrb[60].mxu1  ;;  %v2002_v28 = vpop.eup %2001  ;;  %v1722_v30 = vpack.c.bf16 %v2000_v24, %v1992_v11  ;;  %v1515_v11 = vunpack.c.l.s4 %v2048_v10 }
 0x253   : > { %2021 = vtanh.f32 %v1121_v22  ;;  %v1282_v29 = vadd.f32 %v1281_v26, %v963_v18  ;;  %v1283_v4 = vpop.f32.mrb[61].mxu1  ;;  %v2004_v31 = vpop.eup %2003  ;;  %v1756_v35 = vpack.c.bf16 %v2002_v28, %v1994_v14 }
 0x254   : > { %v968_v32 = vpop.permute.xlu1 %967  ;;  %2023 = vtanh.f32 %v1123_v25  ;;  %v1284_v33 = vadd.f32 %v1283_v4, %v963_v18  ;;  %v1126_v34 = vpop.f32.mrb[62].mxu0  ;;  %1723 = vmatprep.subr.bf16.mxu0 %v1722_v30  ;;  %v1754_v39 = vpack.c.bf16 %v2004_v31, %v1996_v17  ;;  %v1516_v14 = vunpack.c.0.s8 %v1515_v11 }
 0x255   : > { %v2006_v36 = vpop.eup %2005  ;;  %2025 = vtanh.f32 %v1282_v29  ;;  %v1127_v37 = vadd.f32 %v1126_v34, %v968_v32  ;;  %v1128_v38 = vpop.f32.mrb[63].mxu0  ;;  %1725 = vmatpush1.bf16.msra.mxu0 %v1724_v27 }
 0x256   : > { %v2008_v40 = vpop.eup %2007  ;;  %2027 = vtanh.f32 %v1284_v33  ;;  %v1129_v41 = vadd.f32 %v1128_v38, %v968_v32  ;;  %v1287_v42 = vpop.f32.mrb[62].mxu1  ;;  %1755 = vmatprep.subr.bf16.mxu1 %v1754_v39  ;;  %v1519_v22 = vsub.s32 %v1516_v14, %v2103_v5 }
 0x257   : > { %v2010_v43 = vpop.eup %2009  ;;  %2029 = vtanh.f32 %v1127_v37  ;;  %v1288_v44 = vadd.f32 %v1287_v42, %v968_v32  ;;  %v1289_v45 = vpop.f32.mrb[63].mxu1  ;;  %1757 = vmatpush1.bf16.msra.mxu1 %v1756_v35 }
 0x258   : > { %v2012_v46 = vpop.eup %2011  ;;  %2031 = vtanh.f32 %v1129_v41  ;;  %v1290_v47 = vadd.f32 %v1289_v45, %v968_v32  ;;  %v1360_v9 = vpop.permute.xlu0 %1359 }
 0x259   : > { %v2014_v48 = vpop.eup %2013  ;;  %2033 = vtanh.f32 %v1288_v44  ;;  %v1365_v12 = vrot.slane %v1360_v9, %v1364_v8 }
 0x25a   : > { %v2016_v49 = vpop.eup %2015  ;;  %2035 = vtanh.f32 %v1290_v47  ;;  %v1728_v50 = vpack.c.bf16 %v2014_v48, %v2006_v36 }
 0x25b   : > { %v2018_v51 = vpop.eup %2017  ;;  %v1726_v52 = vpack.c.bf16 %v2016_v49, %v2008_v40 }
 0x25c   : > { %v2020_v53 = vpop.eup %2019  ;;  %v1760_v54 = vpack.c.bf16 %v2018_v51, %v2010_v43 }
 0x25d   : > { %v2022_v55 = vpop.eup %2021  ;;  %1727 = vmatprep.subr.bf16.mxu0 %v1726_v52  ;;  %v1758_v56 = vpack.c.bf16 %v2020_v53, %v2012_v46 }
 0x25e   : > { %v2024_v57 = vpop.eup %2023  ;;  %1729 = vmatpush1.bf16.msra.mxu0 %v1728_v50 }
 0x25f   : > { %v2026_v58 = vpop.eup %2025  ;;  %1759 = vmatprep.subr.bf16.mxu1 %v1758_v56 }
 0x260   : > { %v2028_v59 = vpop.eup %2027  ;;  %1761 = vmatpush1.bf16.msra.mxu1 %v1760_v54 }
 0x261   : > { %v2030_v60 = vpop.eup %2029 }
 0x262   : > { %v2032_v61 = vpop.eup %2031  ;;  %v1732_v62 = vpack.c.bf16 %v2030_v60, %v2022_v55 }
 0x263   : > { %v2034_v63 = vpop.eup %2033  ;;  %v1730_v0 = vpack.c.bf16 %v2032_v61, %v2024_v57 }
 0x264   : > { %v2036_v2 = vpop.eup %2035  ;;  %v1764_v3 = vpack.c.bf16 %v2034_v63, %v2026_v58 }
 0x265   : > { %1731 = vmatprep.subr.bf16.mxu0 %v1730_v0  ;;  %v1762_v6 = vpack.c.bf16 %v2036_v2, %v2028_v59 }
 0x266   : > { %1733 = vmatpush1.bf16.msra.mxu0 %v1732_v62 }
 0x267   : > { %1763 = vmatprep.subr.bf16.mxu1 %v1762_v6 }
 0x268   : > { %1765 = vmatpush1.bf16.msra.mxu1 %v1764_v3 }
 0x269   : > { %1431 = vmatmul.mubr.f32.vlgmr.msra.gmra.mrb[64].mxu0 %v1356_v7 }
 0x26b   : > { %1502 = vmatmul.mubr.f32.vlgmr.msra.gmra.mrb[64].mxu1 %v1356_v7 }
 0x33c   : > { %v1432_v13 = vpop.f32.mrb[64].mxu0 }
 0x33d   : > { %v1433_v15 = vadd.f32 %v1432_v13, %v1365_v12  ;;  %v1434_v16 = vpop.f32.mrb[65].mxu0 }
 0x33e   : > { %v1435_v17 = vadd.f32 %v1434_v16, %v1365_v12  ;;  %v1503_v18 = vpop.f32.mrb[64].mxu1 }
 0x33f   : > { %v1504_v19 = vadd.f32 %v1503_v18, %v1365_v12  ;;  %v1505_v20 = vpop.f32.mrb[65].mxu1 }
 0x340   : > { %v1512_v21 = vcombine.low %v1433_v15, %v1435_v17  ;;  %v1506_v23 = vadd.f32 %v1505_v20, %v1365_v12 }
 0x342   : > { %v1513_v24 = vcombine.low %v1504_v19, %v1506_v23  ;;  %v1520_v25 = vrot.slane %v1512_v21, %v1519_v22 }
 0x344   : > { %v1527_v26 = vrot.slane %v1513_v24, %v1519_v22 }
 0x346   : > { %v1528_v27 = vcombine.low %v1520_v25, %v1527_v26 }
 0x348   : > { %v1535_v28 = vrot.slane %v1528_v27, %v1519_v22 }
 0x34a   : > { %1541 = vst.msk [vmem:[%s280_s9] sm:$0xf] %vm1539_vm2, %v1535_v28 }
 0x34b PF: > { %s19_s26 = sadd.s32 1, %s2043_s26  }
 0x34c   : > { %p16_p4 = scmp.ge.s32.totalorder %s19_s26, 4  }
 0x34e   :  { %18 = sbr.rel (!%p16_p4) target bundleno = 3 (0x3), region = 78 }

</bundles_post_ra>
